<compile_context>
chip_gen: v7x
topology: tpu7x:2x2x1
jax: 0.10.0
libtpu: 0.0.40
codegen_flags: <defaults>
</compile_context>

<pallas_src>
import functools
import math

import jax
import jax.numpy as jnp
from jax.experimental import pallas as pl
from jax.experimental.pallas import tpu as pltpu


def _round_up(n, m):
    return ((n + m - 1) // m) * m


def _vmem_limit_bytes(frac=0.65):
    """Generation-aware VMEM limit: ~65% of capacity (v5e/v6e 128 MiB, v7x 64 MiB)."""
    try:
        cap = int(pltpu.get_tpu_info().vmem_capacity_bytes)
    except Exception:
        cap = 64 * 1024 * 1024  # conservative fallback (v7x physical size)
    return int(cap * frac)


def _sage_layer_kernel(a_ref, xk_ref, xtile_ref, invdeg_ref, w_ref, b_ref, o_ref, acc_ref,
                       *, f_in_p, apply_relu):
    """One SAGEConv layer, one (row tile, k chunk) grid step.

    a_ref:      (TM, TK)     int8  edge-count panel (0/1/count, no deg scaling)
    xk_ref:     (TK, Fp)     bf16  k-chunk of node features
    xtile_ref:  (TM, Fp)     bf16  this tile's node features (root / lin_r term)
    invdeg_ref: (TM, 1)      f32   per-row 1/deg
    w_ref:      (2*Fp, Fop)  bf16  stacked [Wl; Wr]
    b_ref:      (1, Fop)     f32   lin_l bias
    o_ref:      (TM, Fop)          output tile (written only at last k step)
    acc_ref:    (TM, Fp)     f32   VMEM scratch: aggregation accumulator
    """
    k = pl.program_id(1)

    @pl.when(k == 0)
    def _():
        acc_ref[...] = jnp.zeros_like(acc_ref)

    # mean-aggregation partial sum: counts (int8 -> bf16, exact) @ X chunk, f32 accumulation
    a_bf = a_ref[...].astype(jnp.bfloat16)
    acc_ref[...] += jnp.dot(a_bf, xk_ref[...], preferred_element_type=jnp.float32)

    @pl.when(k == pl.num_programs(1) - 1)
    def _():
        # deg normalization in f32, then round once to bf16 for the MXU
        agg = (acc_ref[...] * invdeg_ref[...]).astype(jnp.bfloat16)
        # fused lin_l + lin_r as two matmuls against static slices of the stacked weights
        out = (jnp.dot(agg, w_ref[:f_in_p, :], preferred_element_type=jnp.float32)
               + jnp.dot(xtile_ref[...], w_ref[f_in_p:, :], preferred_element_type=jnp.float32)
               + b_ref[...])
        if apply_relu:
            out = jnp.maximum(out, 0.0)
        o_ref[...] = out.astype(o_ref.dtype)


def _sage_layer(a, x, inv_deg, w_stacked, b, *, apply_relu, out_dtype, tm, tk, vmem_limit):
    """a: (Np,Np) int8, x: (Np,Fp) bf16, inv_deg: (Np,1) f32, w_stacked: (2*Fp,Fop) bf16,
    b: (1,Fop) f32."""
    n_p, f_p = x.shape
    f_op = w_stacked.shape[1]
    assert a.shape == (n_p, n_p) and w_stacked.shape[0] == 2 * f_p and b.shape == (1, f_op)
    assert inv_deg.shape == (n_p, 1)
    assert n_p % tm == 0 and n_p % tk == 0 and f_p % 128 == 0 and f_op % 128 == 0

    kernel = functools.partial(_sage_layer_kernel, f_in_p=f_p, apply_relu=apply_relu)

    return pl.pallas_call(
        kernel,
        out_shape=jax.ShapeDtypeStruct((n_p, f_op), out_dtype),
        grid=(n_p // tm, n_p // tk),
        in_specs=[
            pl.BlockSpec((tm, tk), lambda i, k: (i, k)),          # A panel (int8, streamed)
            pl.BlockSpec((tk, f_p), lambda i, k: (k, 0)),         # X k-chunk
            pl.BlockSpec((tm, f_p), lambda i, k: (i, 0)),         # X row tile (root term)
            pl.BlockSpec((tm, 1), lambda i, k: (i, 0)),           # 1/deg per row (f32)
            pl.BlockSpec((2 * f_p, f_op), lambda i, k: (0, 0)),   # stacked [Wl; Wr]
            pl.BlockSpec((1, f_op), lambda i, k: (0, 0)),         # bias
        ],
        out_specs=pl.BlockSpec((tm, f_op), lambda i, k: (i, 0)),
        scratch_shapes=[pltpu.VMEM((tm, f_p), jnp.float32)],      # f32 agg accumulator
        compiler_params=pltpu.CompilerParams(
            # node tiles independent (megacore on v7x); k is the resident-output reduction
            dimension_semantics=("parallel", "arbitrary"),
            vmem_limit_bytes=vmem_limit,
        ),
    )(a, x, x, inv_deg, w_stacked, b)


def gnn_forward(x, edge_index, params, *, tm=256, tk=512):
    """x: [N, Fin] f32, edge_index: [2, E] int32 (row 0 = src, row 1 = dst).

    tm/tk: sweep per generation -- 256-512 comfortable on v5e/v6e (128 MiB VMEM),
    128-256 on v7x (64 MiB VMEM).
    """
    n, fin = x.shape
    wl1, bl1, wr1 = params["wl1"], params["bl1"], params["wr1"]
    wl2, bl2, wr2 = params["wl2"], params["bl2"], params["wr2"]
    hid = wl1.shape[1]
    out_c = wl2.shape[1]

    n_p = _round_up(n, math.lcm(tm, tk))
    fin_p = _round_up(fin, 128)
    hid_p = _round_up(hid, 128)
    out_p = _round_up(out_c, 128)

    # --- glue: build padded int8 edge-count matrix directly (adj[i, j] = #edges j->i)
    #     and a per-row f32 1/deg vector; deg normalization happens in-kernel in f32.
    src = edge_index[0].astype(jnp.int32)
    dst = edge_index[1].astype(jnp.int32)
    a_p = jnp.zeros((n_p, n_p), jnp.int8).at[dst, src].add(
        jnp.ones_like(src, dtype=jnp.int8))
    deg = jnp.zeros((n_p,), jnp.float32).at[dst].add(1.0)
    inv_deg = (1.0 / jnp.maximum(deg, 1.0)).reshape(n_p, 1)   # rows with no in-edges -> agg 0

    x_p = jnp.zeros((n_p, fin_p), jnp.bfloat16).at[:n, :fin].set(x.astype(jnp.bfloat16))

    # stacked weights: [Wl; Wr] with each half zero-padded to lane width
    w1 = jnp.zeros((2 * fin_p, hid_p), jnp.bfloat16)
    w1 = w1.at[:fin, :hid].set(wl1.astype(jnp.bfloat16))
    w1 = w1.at[fin_p:fin_p + fin, :hid].set(wr1.astype(jnp.bfloat16))
    b1 = jnp.zeros((1, hid_p), jnp.float32).at[:, :hid].set(bl1)

    w2 = jnp.zeros((2 * hid_p, out_p), jnp.bfloat16)
    w2 = w2.at[:hid, :out_c].set(wl2.astype(jnp.bfloat16))
    w2 = w2.at[hid_p:hid_p + hid, :out_c].set(wr2.astype(jnp.bfloat16))
    b2 = jnp.zeros((1, out_p), jnp.float32).at[:, :out_c].set(bl2)

    vmem_limit = _vmem_limit_bytes()

    # two pipelined K-tiled passes (layer 2 needs h for all nodes)
    h = _sage_layer(a_p, x_p, inv_deg, w1, b1, apply_relu=True, out_dtype=jnp.bfloat16,
                    tm=tm, tk=tk, vmem_limit=vmem_limit)
    o = _sage_layer(a_p, h, inv_deg, w2, b2, apply_relu=False, out_dtype=jnp.float32,
                    tm=tm, tk=tk, vmem_limit=vmem_limit)
    return o[:n, :out_c]


def init_params(key, in_channels, hidden_channels, out_channels):
    ks = jax.random.split(key, 6)
    s = 0.1
    return {
        # conv1: lin_l (with bias) on aggregated msgs, lin_r (no bias) on root
        "wl1": s * jax.random.normal(ks[0], (in_channels, hidden_channels), jnp.float32),
        "bl1": s * jax.random.normal(ks[1], (1, hidden_channels), jnp.float32),
        "wr1": s * jax.random.normal(ks[2], (in_channels, hidden_channels), jnp.float32),
        # conv2
        "wl2": s * jax.random.normal(ks[3], (hidden_channels, out_channels), jnp.float32),
        "bl2": s * jax.random.normal(ks[4], (1, out_channels), jnp.float32),
        "wr2": s * jax.random.normal(ks[5], (hidden_channels, out_channels), jnp.float32),
    }


if __name__ == "__main__":
    N, FIN, HID, OUT = 256, 16, 32, 8
    TM, TK = 128, 128   # -> grid=(2, 2): exercises the parallel row axis and the k accumulator

    key = jax.random.PRNGKey(0)
    kx, kp = jax.random.split(key)
    x = jax.random.normal(kx, (N, FIN), jnp.float32)

    # deterministic edge list: bidirectional ring + fixed long-range edges
    ring_src = jnp.arange(N, dtype=jnp.int32)
    ring_dst = (ring_src + 1) % N
    extra_src = jnp.arange(0, N, 7, dtype=jnp.int32)
    extra_dst = (extra_src * 13 + 5) % N
    src = jnp.concatenate([ring_src, ring_dst, extra_src])
    dst = jnp.concatenate([ring_dst, ring_src, extra_dst])
    edge_index = jnp.stack([src, dst], axis=0)               # [2, E]

    params = init_params(kp, FIN, HID, OUT)

    out = gnn_forward(x, edge_index, params, tm=TM, tk=TK)
    out = jax.block_until_ready(out)

    # plain-JAX reference mirroring the kernel's numerics:
    #   exact int edge counts, bf16 X/W, f32 accumulation, f32 deg normalization,
    #   agg rounded to bf16 before lin_l, layer-1 output stored in bf16.
    def bf(z):
        return z.astype(jnp.bfloat16).astype(jnp.float32)

    adj = jnp.zeros((N, N), jnp.float32).at[dst, src].add(1.0)
    deg = jnp.clip(adj.sum(axis=1, keepdims=True), 1.0, None)

    def sage_ref(xx, wl, wr, b, relu):
        agg = (adj @ bf(xx)) / deg
        o = bf(agg) @ bf(wl) + bf(xx) @ bf(wr) + b
        return jnp.maximum(o, 0.0) if relu else o

    h_ref = bf(sage_ref(x, params["wl1"], params["wr1"], params["bl1"], True))
    o_ref = sage_ref(h_ref, params["wl2"], params["wr2"], params["bl2"], False)

    assert out.shape == (N, OUT)
    assert jnp.allclose(out, o_ref, atol=5e-3, rtol=5e-3), \
        float(jnp.max(jnp.abs(out - o_ref)))

    print("KERNEL_OK")
</pallas_src>

<mosaic_0001>
module attributes {stable_mosaic.version = 11 : i64} {
  func.func @_sage_layer_kernel(%arg0: i32, %arg1: i32, %arg2: memref<128x128xi8, #tpu.memory_space<vmem>>, %arg3: memref<128x128xbf16, #tpu.memory_space<vmem>>, %arg4: memref<128x128xbf16, #tpu.memory_space<vmem>>, %arg5: memref<128x1xf32, #tpu.memory_space<vmem>>, %arg6: memref<256x128xbf16, #tpu.memory_space<vmem>>, %arg7: memref<1x128xf32, #tpu.memory_space<vmem>>, %arg8: memref<128x128xbf16, #tpu.memory_space<vmem>>, %arg9: memref<128x128xf32, #tpu.memory_space<vmem>>) attributes {dimension_semantics = [#tpu.dimension_semantics<parallel>, #tpu.dimension_semantics<arbitrary>], iteration_bounds = array<i64: 2, 2>, scalar_prefetch = 0 : i64, scratch_operands = 1 : i64, tpu.core_type = #tpu.core_type<tc>, window_params = [{transform_indices = @transform_0, window_bounds = array<i64: 128, 128>}, {transform_indices = @transform_1, window_bounds = array<i64: 128, 128>}, {transform_indices = @transform_2, window_bounds = array<i64: 128, 128>}, {transform_indices = @transform_3, window_bounds = array<i64: 128, 1>}, {pipeline_mode = #tpu.pipeline_mode<synchronous>, transform_indices = @transform_4, window_bounds = array<i64: 256, 128>}, {pipeline_mode = #tpu.pipeline_mode<synchronous>, transform_indices = @transform_5, window_bounds = array<i64: 1, 128>}, {transform_indices = @transform_6, window_bounds = array<i64: 128, 128>}]} {
    %c0_i32 = arith.constant 0 : i32
    %0 = arith.cmpi eq, %arg1, %c0_i32 : i32
    %1 = arith.extui %0 : i1 to i32
    %c0_i32_0 = arith.constant 0 : i32
    %2 = arith.cmpi ne, %1, %c0_i32_0 : i32
    scf.if %2 {
      %cst_9 = arith.constant 0.000000e+00 : f32
      %13 = vector.broadcast %cst_9 : f32 to vector<128x128xf32>
      %c0_10 = arith.constant 0 : index
      %c0_11 = arith.constant 0 : index
      %14 = vector.load %arg9[%c0_10, %c0_11] : memref<128x128xf32, #tpu.memory_space<vmem>>, vector<128x128xf32>
      tpu.vector_store %arg9[%c0_10, %c0_11], %13 {strides = array<i32>} : memref<128x128xf32, #tpu.memory_space<vmem>>, vector<128x128xf32>,
    } else {
    }
    %c0 = arith.constant 0 : index
    %c0_1 = arith.constant 0 : index
    %3 = vector.load %arg2[%c0, %c0_1] : memref<128x128xi8, #tpu.memory_space<vmem>>, vector<128x128xi8>
    %4 = arith.sitofp %3 : vector<128x128xi8> to vector<128x128xbf16>
    %c0_2 = arith.constant 0 : index
    %c0_3 = arith.constant 0 : index
    %5 = vector.load %arg9[%c0_2, %c0_3] : memref<128x128xf32, #tpu.memory_space<vmem>>, vector<128x128xf32>
    %c0_4 = arith.constant 0 : index
    %c0_5 = arith.constant 0 : index
    %6 = vector.load %arg3[%c0_4, %c0_5] : memref<128x128xbf16, #tpu.memory_space<vmem>>, vector<128x128xbf16>
    %cst = arith.constant dense<0.000000e+00> : vector<128x128xf32>
    %7 = tpu.matmul %4, %6, %cst {dimension_numbers = #tpu.dot_dimension_numbers<[1], [0], [0], [1], [0, 0, 1, 1], [], []>} : vector<128x128xbf16>, vector<128x128xbf16>, vector<128x128xf32> -> vector<128x128xf32>
    %8 = arith.addf %5, %7 : vector<128x128xf32>
    %c0_6 = arith.constant 0 : index
    %c0_7 = arith.constant 0 : index
    %9 = vector.load %arg9[%c0_6, %c0_7] : memref<128x128xf32, #tpu.memory_space<vmem>>, vector<128x128xf32>
    tpu.vector_store %arg9[%c0_6, %c0_7], %8 {strides = array<i32>} : memref<128x128xf32, #tpu.memory_space<vmem>>, vector<128x128xf32>,
    %c1_i32 = arith.constant 1 : i32
    %10 = arith.cmpi eq, %arg1, %c1_i32 : i32
    %11 = arith.extui %10 : i1 to i32
    %c0_i32_8 = arith.constant 0 : i32
    %12 = arith.cmpi ne, %11, %c0_i32_8 : i32
    scf.if %12 {
      %c0_9 = arith.constant 0 : index
      %c0_10 = arith.constant 0 : index
      %13 = vector.load %arg9[%c0_9, %c0_10] : memref<128x128xf32, #tpu.memory_space<vmem>>, vector<128x128xf32>
      %c0_11 = arith.constant 0 : index
      %c0_12 = arith.constant 0 : index
      %14 = vector.load %arg5[%c0_11, %c0_12] : memref<128x1xf32, #tpu.memory_space<vmem>>, vector<128x1xf32>
      %15 = vector.broadcast %14 : vector<128x1xf32> to vector<128x128xf32>
      %16 = arith.mulf %13, %15 : vector<128x128xf32>
      %17 = arith.truncf %16 : vector<128x128xf32> to vector<128x128xbf16>
      %c0_13 = arith.constant 0 : index
      %c0_14 = arith.constant 0 : index
      %18 = vector.load %arg6[%c0_13, %c0_14] : memref<256x128xbf16, #tpu.memory_space<vmem>>, vector<128x128xbf16>
      %cst_15 = arith.constant dense<0.000000e+00> : vector<128x128xf32>
      %19 = tpu.matmul %17, %18, %cst_15 {dimension_numbers = #tpu.dot_dimension_numbers<[1], [0], [0], [1], [0, 0, 1, 1], [], []>} : vector<128x128xbf16>, vector<128x128xbf16>, vector<128x128xf32> -> vector<128x128xf32>
      %c0_16 = arith.constant 0 : index
      %c0_17 = arith.constant 0 : index
      %20 = vector.load %arg4[%c0_16, %c0_17] : memref<128x128xbf16, #tpu.memory_space<vmem>>, vector<128x128xbf16>
      %c128 = arith.constant 128 : index
      %c0_18 = arith.constant 0 : index
      %21 = vector.load %arg6[%c128, %c0_18] : memref<256x128xbf16, #tpu.memory_space<vmem>>, vector<128x128xbf16>
      %cst_19 = arith.constant dense<0.000000e+00> : vector<128x128xf32>
      %22 = tpu.matmul %20, %21, %cst_19 {dimension_numbers = #tpu.dot_dimension_numbers<[1], [0], [0], [1], [0, 0, 1, 1], [], []>} : vector<128x128xbf16>, vector<128x128xbf16>, vector<128x128xf32> -> vector<128x128xf32>
      %23 = arith.addf %19, %22 : vector<128x128xf32>
      %c0_20 = arith.constant 0 : index
      %c0_21 = arith.constant 0 : index
      %24 = vector.load %arg7[%c0_20, %c0_21] : memref<1x128xf32, #tpu.memory_space<vmem>>, vector<1x128xf32>
      %25 = vector.broadcast %24 : vector<1x128xf32> to vector<128x128xf32>
      %26 = arith.addf %23, %25 : vector<128x128xf32>
      %cst_22 = arith.constant 0.000000e+00 : f32
      %27 = vector.broadcast %cst_22 : f32 to vector<128x128xf32>
      %28 = arith.maximumf %26, %27 : vector<128x128xf32>
      %29 = arith.truncf %28 : vector<128x128xf32> to vector<128x128xbf16>
      %c0_23 = arith.constant 0 : index
      %c0_24 = arith.constant 0 : index
      %30 = vector.load %arg8[%c0_23, %c0_24] : memref<128x128xbf16, #tpu.memory_space<vmem>>, vector<128x128xbf16>
      tpu.vector_store %arg8[%c0_23, %c0_24], %29 {strides = array<i32>} : memref<128x128xbf16, #tpu.memory_space<vmem>>, vector<128x128xbf16>,
    } else {
    }
    return
  }
  func.func @transform_0(%arg0: i32, %arg1: i32) -> (i32, i32) {
    %c0_i32 = arith.constant 0 : i32
    return %arg0, %arg1 : i32, i32
  }
  func.func @transform_1(%arg0: i32, %arg1: i32) -> (i32, i32) {
    %c0_i32 = arith.constant 0 : i32
    %c0_i32_0 = arith.constant 0 : i32
    return %arg1, %c0_i32 : i32, i32
  }
  func.func @transform_2(%arg0: i32, %arg1: i32) -> (i32, i32) {
    %c0_i32 = arith.constant 0 : i32
    %c0_i32_0 = arith.constant 0 : i32
    return %arg0, %c0_i32 : i32, i32
  }
  func.func @transform_3(%arg0: i32, %arg1: i32) -> (i32, i32) {
    %c0_i32 = arith.constant 0 : i32
    %c0_i32_0 = arith.constant 0 : i32
    return %arg0, %c0_i32 : i32, i32
  }
  func.func @transform_4(%arg0: i32, %arg1: i32) -> (i32, i32) {
    %c0_i32 = arith.constant 0 : i32
    %c0_i32_0 = arith.constant 0 : i32
    %c0_i32_1 = arith.constant 0 : i32
    return %c0_i32, %c0_i32_0 : i32, i32
  }
  func.func @transform_5(%arg0: i32, %arg1: i32) -> (i32, i32) {
    %c0_i32 = arith.constant 0 : i32
    %c0_i32_0 = arith.constant 0 : i32
    %c0_i32_1 = arith.constant 0 : i32
    return %c0_i32, %c0_i32_0 : i32, i32
  }
  func.func @transform_6(%arg0: i32, %arg1: i32) -> (i32, i32) {
    %c0_i32 = arith.constant 0 : i32
    %c0_i32_0 = arith.constant 0 : i32
    return %arg0, %c0_i32 : i32, i32
  }
}

</mosaic_0001>

<bundles_post_ra>
// kernel: tpu_custom_call.1
= control target key start
LH: loop header
LB: loop body
LE: loop exit
PB: predicated region body
PF: predicated region fallthrough
CT: control target
= control target key end

     0   :  { %s2505_s0 = inlined_call_operand.vmem [shape: s8[256,256], index: 0, kind: input, shape index: {}]   ;;  %s2506_s1 = inlined_call_operand.vmem [shape: bf16[256,128], index: 1, kind: input, shape index: {}]   ;;  %s2507_s2 = inlined_call_operand.hbm [shape: bf16[256,128], index: 2, kind: input, shape index: {}]   ;;  %s2508_s3 = inlined_call_operand.vmem [shape: f32[256,1], index: 3, kind: input, shape index: {}]   ;;  %s2509_s4 = inlined_call_operand.hbm [shape: bf16[256,128], index: 4, kind: input, shape index: {}]   ;;  %s2510_s5 = inlined_call_operand.vmem [shape: f32[1,128], index: 5, kind: input, shape index: {}]   ;;  %s2511_s6 = inlined_call_operand.hbm [shape: bf16[256,128], index: 6, kind: output, shape index: {}]  }
   0x1   :  { %2525 = sst [smem:[#allocation20_spill]] %s2508_s3 }
   0x2   :  { %2526 = sst [smem:[#allocation21_spill]] %s2510_s5 }
   0x3   :  { %2527 = sst [smem:[#allocation22_spill]] %s2511_s6 }
   0x4   :  { %11 = vsyncpa [#allocation5], 0 }
   0x5   :  { %13 = vsyncpa [#allocation5 + $0x1], 0 }
   0x6   :  { %14 = vsyncpa [#allocation8], 0 }
   0x7   :  { %15 = vsyncpa [#allocation6], 0 }
   0x8   :  { %17 = vsyncpa [#allocation6 + $0x1], 0  ;;  %s2137_s21 = smov 0   ;;  %s2139_s22 = smov 0  }
   0x9   :  { %s2141_s23 = smov 0   ;;  %s2143_s24 = smov 0  }
   0xa   :  { %s2145_s25 = smov 0   ;;  %s2147_s26 = smov 0  }
   0xb   :  { %s2149_s27 = smov 0   ;;  %s2151_s28 = smov 0  }
   0xc   :  { %s2153_s29 = smov 0   ;;  %s2155_s30 = smov 0  }
   0xd LB: > { %2528 = sst [smem:[#allocation13_spill]] %s2053_s21  ;;  %s1454_s7 = sadd.s32 4294967295, %s2089_s30   ;;  %s2089_s30 = sphi %s2155_s30, %s23_s30   ;;  %s2085_s29 = sphi %s2153_s29, %s2569_s29   ;;  %s2081_s28 = sphi %s2151_s28, %s2568_s28   ;;  %s2077_s27 = sphi %s2149_s27, %s2567_s27   ;;  %s2073_s26 = sphi %s2147_s26, %s2566_s26   ;;  %s2069_s25 = sphi %s2145_s25, %s2565_s25   ;;  %s2065_s24 = sphi %s2143_s24, %s2564_s24   ;;  %s2061_s23 = sphi %s2141_s23, %s2563_s23   ;;  %s2057_s22 = sphi %s2139_s22, %s2562_s22   ;;  %s2053_s21 = sphi %s2137_s21, %s2561_s21  }
   0xe   : > { %s1455_s8 = sadd.s32 4294967294, %s2089_s30   ;;  %s32_s9 = sadd.s32 1, %s2081_s28 }
   0xf   : > { %s35_s10 = sadd.s32 1, %s2085_s29  ;;  %p33_p0 = scmp.ge.s32.totalorder %s32_s9, 2 }
  0x10   : > { %s44_s11 = sadd.s32 1, %s2069_s25  ;;  %p51_p1 = scmp.ne.s32.totalorder %s2069_s25, %s2065_s24 }
  0x11   : > { %p52_p2 = scmp.eq.s32.totalorder %s2089_s30, 0  ;;  %s2571_s9 = smov (%p33_p0, %s32_s9), 0 }
  0x12   : > { %2529 = sst [smem:[#allocation14_spill]] %s2571_s9  ;;  %s2573_s10 = smov (!%p33_p0, %s35_s10), %s2085_s29 }
  0x13   : > { %s40_s12 = ssub.s32 %s2081_s28, %s2571_s9  ;;  %p2200_p3 = por %p52_p2, %p51_p1 }
  0x14   : > { %p37_p4 = scmp.ge.s32.totalorder %s2573_s10, 2  ;;  %s96_s14 = sadd.s32 1, %s2061_s23 }
  0x15   : > { %s2530_s13 = scalar_select %p2200_p3, 1, 0 }
  0x16   : > { %p103_p5 = scmp.ne.s32.totalorder %s2061_s23, %s2057_s22  ;;  %p109_p6 = scmp.ne.s32.totalorder %s2057_s22, %s2053_s21 }
  0x17   : > { %s2575_s10 = smov (%p37_p4, %s2573_s10), 0  ;;  %p2218_p8 = scmp.eq.s32.totalorder %s1454_s7, 0 }
  0x18   : > { %2531 = sst [smem:[#allocation15_spill]] %s2575_s10  ;;  %p2214_p7 = por %p103_p5, %p52_p2 }
  0x19   : > { %s2533_s16 = scalar_select %p2218_p8, 1, 0 }
  0x1a   : > { %s2532_s15 = scalar_select %p2214_p7, 1, 0 }
  0x1b   : > { %s39_s17 = ssub.s32 %s2085_s29, %s2575_s10  ;;  %p201_p9 = scmp.eq.s32.totalorder %s1454_s7, 3 }
  0x1c   : > { %s41_s18 = sor.u32 %s40_s12, %s39_s17  ;;  %p94_p10 = scmp.eq.s32.totalorder %s39_s17, 0 }
  0x1d   : > { %p42_p11 = scmp.eq.s32.totalorder %s41_s18, 0  ;;  %p2229_p12 = por %p2218_p8, %p109_p6 }
  0x1e   : > { %s2234_s20 = scalar_select %p94_p10, %s2061_s23, %s96_s14  }
  0x1f   : > { %s2534_s19 = scalar_select %p2229_p12, 1, 0 }
  0x20   : > { %2535 = sst [smem:[#allocation16_spill]] %s2234_s20  ;;  %p2242_p13 = por %p201_p9, %p103_p5 }
  0x21   : > { %s2237_s9 = scalar_select %p42_p11, %s2069_s25, %s44_s11  }
  0x22   : > { %s2537_s6 = scalar_select %p2242_p13, 1, 0 }
  0x23   : > { %2536 = sst [smem:[#allocation17_spill]] %s2237_s9  ;;  %p207_p0 = scmp.eq.s32.totalorder %s1455_s8, 3 }
  0x24   : > { %2538 = sst [smem:[#allocation18_spill]] %s2537_s6  ;;  %p1456_p1 = scmp.ge.s32.totalorder %s2089_s30, 1 }
  0x25   : > { %p214_p2 = scmp.lt.s32.totalorder %s2089_s30, 5  ;;  %p2251_p4 = por %p207_p0, %p109_p6 }
  0x26   : > { %s2091_s11 = smov [#allocation7]   ;;  %s1915_s10 = scalar_lea.hbm %s2509_s4, 2048 }
  0x27   : > { %s2539_s7 = scalar_select %p2251_p4, 1, 0 }
  0x28   : > { %p2255_p7 = pnand %p1456_p1, %p214_p2  ;;  %s226_s14 = sshll.u32 %s2091_s11, 4  ;;  %s227_s14 = int_to_ptr.vmem [resolvable:$true] %s226_s14 }
  0x29   : > { %2540 = sst [smem:[#allocation19_spill]] %s2539_s7  ;;  %p1916_p6 = scmp.ne.s32.totalorder %s2509_s4, %s1915_s10 }
  0x2a   : > { %s2541_s12 = scalar_select %p2255_p7, 1, 0 }
  0x2b   : > { %p1781_p5 = pneg %p2255_p7  ;;  %p1922_p1 = scmp.lt.u32.totalorder %s1915_s10, %s2509_s4 }
  0x2d   : > { %p2263_p9 = pnand %p1781_p5, %p2218_p8 }
  0x2f   : > { %p1917_p10 = pneg %p2263_p9 }
  0x31   : > { %p1918_p11 = pnand %p1917_p10, %p1916_p6 }
  0x33   : > { %p1919_p0 = pneg %p1918_p11 }
  0x35   : > { %p1924_p2 = pnand %p1922_p1, %p1919_p0 }
  0x37   : > { %1927 = shalt.err (!%p1924_p2)
}
  0x38   : > { %s1928_s21 = scalar_lea.vmem %s227_s14, 2048  ;;  %p1936_p8 = scmp.lt.s32.totalorder %s227_s14, %s227_s14 }
  0x39   : > { %p1929_p5 = scmp.ne.s32.totalorder %s227_s14, %s1928_s21  ;;  %p1937_p12 = scmp.lt.s32.totalorder %s1928_s21, %s1928_s21 }
  0x3b   : > { %p1931_p4 = pnand %p1929_p5, %p1917_p10  ;;  %p1938_p7 = por %p1937_p12, %p1936_p8 }
  0x3d   : > { %p1932_p13 = pneg %p1931_p4 }
  0x3f   : > { %p1939_p3 = pnand %p1938_p7, %p1932_p13 }
  0x41   : > { %1942 = shalt.err (!%p1939_p3)
}
  0x42   : > { %s2092_s9 = smov 64   ;;  %s2093_s20 = smov 4  }
  0x43   : > { %1784 = dma.hbm_to_vmem [thread:$0]  (!%p2263_p9), %s2509_s4, 2048, %s227_s14, [#allocation8], %s2092_s9, %s2092_s9, %s2093_s20  }
  0x44   : > { %p1458_p6 = scmp.ge.s32.totalorder %s2089_s30, 4 }
  0x45   : > { %p2543_p11 = scmp.ne.s32.totalorder (!%p1458_p6), %s2530_s13, 0 }
  0x46   : > { %239 = sbr.rel (%p1458_p6) target bundleno = 112 (0x70), region = 24 }
  0x4d   : > { %242 = sbr.rel (!%p2543_p11) target bundleno = 85 (0x55), region = 28  ;;  %s244_s21 = sand.u32 (%p2543_p11), 1, %s2069_s25  }
  0x4e   : > { %s1531_s10 = sshll.u32 (%p2543_p11), %s2085_s29, 3  ;;  %s1459_s7 = sshll.u32 (%p2543_p11), %s244_s21, 5 }
  0x4f   : > { %s249_s11 = sadd.s32 (%p2543_p11), %s2081_s28, %s1531_s10  ;;  %s246_s14 = scalar_lea.vmem (%p2543_p11), [#allocation3], %s1459_s7 }
  0x50   : > { %s1462_s6 = sshll.u32 (%p2543_p11), %s249_s11, 3 }
  0x51   : > { %s251_s3 = scalar_lea.vmem (%p2543_p11), %s2505_s0, %s1462_s6 }
  0x52   : > { %v285_v0 = vld [vmem:[%s251_s3] sm:$0xff] (%p2543_p11)  ;;  %v287_v1 = vld [vmem:[%s251_s3 + $0x10] sm:$0xff] (%p2543_p11) }
  0x53   : > { %v289_v2 = vld [vmem:[%s251_s3 + $0x20] sm:$0xff] (%p2543_p11)  ;;  %286 = vst [vmem:[%s246_s14] sm:$0xff] (%p2543_p11), %v285_v0  ;;  %288 = vst [vmem:[%s246_s14 + $0x8] sm:$0xff] (%p2543_p11), %v287_v1  ;;  %v291_v3 = vld [vmem:[%s251_s3 + $0x30] sm:$0xff] (%p2543_p11) }
  0x54   : > { %290 = vst [vmem:[%s246_s14 + $0x10] sm:$0xff] %v289_v2  ;;  %292 = vst [vmem:[%s246_s14 + $0x18] sm:$0xff] %v291_v3 }
  0x55 PF: > { %s308_s13 = sand.u32 1, %s2061_s23   ;;  %s1532_s9 = sshll.u32 %s2085_s29, 10 }
  0x56   : > { %s1463_s20 = sshll.u32 %s308_s13, 6  ;;  %s2297_s5 = scalar_lea.hbm %s2507_s2, %s1532_s9 }
  0x57   : > { %s312_s6 = scalar_lea.vmem [#allocation4], %s1463_s20  ;;  %s2301_s3 = scalar_lea.sflag [#allocation5], %s308_s13 }
  0x58   : > { %s319_s21 = sshll.u32 %s312_s6, 4  ;;  %s1943_s10 = scalar_lea.hbm %s2297_s5, 1024  ;;  %s2299_s21 = int_to_ptr.vmem [resolvable:$true] %s319_s21 }
  0x59   : > { %p1944_p3 = scmp.ne.s32.totalorder %s2297_s5, %s1943_s10  ;;  %p2544_p7 = scmp.ne.s32.totalorder %s2532_s15, 0 }
  0x5a   : > { %s1947_s8 = scalar_lea.hbm %s2507_s2, 2048  ;;  %p1948_p13 = scmp.lt.u32.totalorder %s2297_s5, %s2507_s2 }
  0x5b   : > { %p1945_p8 = pnand %p1944_p3, %p2544_p7  ;;  %p1949_p4 = scmp.lt.u32.totalorder %s1947_s8, %s1943_s10 }
  0x5c   : > { %p1951_p10 = scmp.lt.u32.totalorder %s1943_s10, %s2297_s5 }
  0x5d   : > { %p1946_p12 = pneg %p1945_p8  ;;  %p1950_p9 = por %p1949_p4, %p1948_p13 }
  0x5f   : > { %p1952_p0 = por %p1951_p10, %p1950_p9 }
  0x61   : > { %p1953_p1 = pnand %p1952_p0, %p1946_p12 }
  0x63   : > { %1956 = shalt.err (!%p1953_p1)
}
  0x64   : > { %s1957_s13 = scalar_lea.vmem %s2299_s21, 1024  ;;  %s2094_s20 = smov [#allocation4]  }
  0x65   : > { %p1958_p2 = scmp.ne.s32.totalorder %s2299_s21, %s1957_s13  ;;  %s1961_s17 = sshll.u32 %s2094_s20, 4  ;;  %s1962_s17 = int_to_ptr.vmem [resolvable:$false] %s1961_s17 }
  0x66   : > { %s1963_s18 = scalar_lea.vmem %s1962_s17, 2048  ;;  %p1964_p11 = scmp.lt.s32.totalorder %s2299_s21, %s1962_s17 }
  0x67   : > { %p1959_p5 = pnand %p1958_p2, %p2544_p7  ;;  %p1965_p3 = scmp.lt.s32.totalorder %s1963_s18, %s1957_s13 }
  0x69   : > { %p1960_p6 = pneg %p1959_p5  ;;  %p1966_p8 = por %p1965_p3, %p1964_p11 }
  0x6b   : > { %p1967_p13 = pnand %p1966_p8, %p1960_p6 }
  0x6d   : > { %1970 = shalt.err (!%p1967_p13)
}
  0x6e   : > { %s2095_s6 = smov 64   ;;  %s2096_s10 = smov 4  }
  0x6f   : > { %1775 = dma.hbm_to_vmem [thread:$0]  (%p2544_p7), %s2297_s5, 1024, %s2299_s21, %s2301_s3, %s2095_s6, %s2095_s6, %s2096_s10  }
  0x70 PF: > { %p2545_p12 = scmp.ne.s32.totalorder %s2541_s12, 0 }
  0x71   : > { %s343_s7 = sand.u32 (!%p2545_p12), 1, %s2065_s24   ;;  %s2329_s11 = sand.u32 (!%p2545_p12), 1, %s2057_s22  }
  0x72   : > { %340 = sbr.rel (%p2545_p12) target bundleno = 782 (0x30e), region = 78  ;;  %s1467_s8 = sshll.u32 (!%p2545_p12), %s343_s7, 5 }
  0x73   : > { %s1468_s14 = sshll.u32 (!%p2545_p12), %s2329_s11, 6  ;;  %s2332_s9 = scalar_lea.vmem (!%p2545_p12), [#allocation3], %s1467_s8 }
  0x74   : > { %s350_s13 = scalar_lea.sflag (!%p2545_p12), [#allocation5], %s2329_s11  ;;  %s2335_s20 = scalar_lea.vmem (!%p2545_p12), [#allocation4], %s1468_s14 }
  0x75   : > { %p2546_p7 = scmp.ne.s32.totalorder (!%p2545_p12), %s2534_s19, 0 }
  0x79   : > { %2040 = dma.done.wait (%p2546_p7), %s350_s13, 1024  }
  0x7a   : > { %2042 = vsyncadd (%p2546_p7), %s350_s13, 4294966272  ;;  %p2547_p4 = scmp.ne.s32.totalorder %s2533_s16, 0 }
  0x7c   : > { %2044 = dma.done.wait (%p2547_p4), [#allocation8], 2048  }
  0x7d   : > { %2046 = vsyncadd (%p2547_p4), [#allocation8], 4294965248  ;;  %s1471_s24 = sshll.u32 %s2073_s26, 4  ;;  %s1473_s15 = sshll.u32 %s2077_s27, 4 }
  0x7e   : > { %p402_p9 = scmp.lt.s32.totalorder %s1471_s24, 31  ;;  %p409_p10 = scmp.lt.s32.totalorder %s1473_s15, 31 }
  0x7f   : > { %s2548_s6 = sld [smem:[#allocation20_spill]]  ;;  %s2357_s10 = scalar_lea.vmem [#allocation9], %s1468_s14 }
  0x80   : > { %s2577_s24 = smov (!%p402_p9, %s1471_s24), 31  ;;  %s2579_s15 = smov (!%p409_p10, %s1473_s15), 31 }
  0x81   : > { %s1472_s12 = sshll.u32 %s2577_s24, 2  ;;  %s1474_s3 = sshll.u32 %s2579_s15, 3 }
  0x82   : > { %s2350_s19 = scalar_lea.vmem %s2506_s1, %s1472_s12  ;;  %p1475_p0 = scmp.ne.s32.totalorder %s2073_s26, 0 }
  0x83   : > { %v2097_v4 = vmov (!%p1475_p0), 0.0  }
  0x84   : > { %419 = sbr.rel (%p1475_p0) target bundleno = 140 (0x8c), region = 94  ;;  %420 = vst [vmem:[#allocation2] sm:$0xff] (!%p1475_p0), %v2097_v4  ;;  %421 = vst [vmem:[#allocation2 + $0x8] sm:$0xff] (!%p1475_p0), %v2097_v4 }
  0x85   : > { %s2355_s16 = scalar_lea.vmem %s2548_s6, %s1474_s3  ;;  %422 = vst [vmem:[#allocation2 + $0x10] sm:$0xff] (!%p1475_p0), %v2097_v4  ;;  %423 = vst [vmem:[#allocation2 + $0x18] sm:$0xff] (!%p1475_p0), %v2097_v4 }
  0x86   : > { %424 = vst [vmem:[#allocation2 + $0x20] sm:$0xff] (!%p1475_p0), %v2097_v4  ;;  %425 = vst [vmem:[#allocation2 + $0x28] sm:$0xff] (!%p1475_p0), %v2097_v4 }
  0x87   : > { %426 = vst [vmem:[#allocation2 + $0x30] sm:$0xff] (!%p1475_p0), %v2097_v4  ;;  %427 = vst [vmem:[#allocation2 + $0x38] sm:$0xff] (!%p1475_p0), %v2097_v4 }
  0x88   : > { %428 = vst [vmem:[#allocation2 + $0x40] sm:$0xff] (!%p1475_p0), %v2097_v4  ;;  %429 = vst [vmem:[#allocation2 + $0x48] sm:$0xff] (!%p1475_p0), %v2097_v4 }
  0x89   : > { %430 = vst [vmem:[#allocation2 + $0x50] sm:$0xff] (!%p1475_p0), %v2097_v4  ;;  %431 = vst [vmem:[#allocation2 + $0x58] sm:$0xff] (!%p1475_p0), %v2097_v4 }
  0x8a   : > { %432 = vst [vmem:[#allocation2 + $0x60] sm:$0xff] (!%p1475_p0), %v2097_v4  ;;  %433 = vst [vmem:[#allocation2 + $0x68] sm:$0xff] (!%p1475_p0), %v2097_v4 }
  0x8b   : > { %434 = vst [vmem:[#allocation2 + $0x70] sm:$0xff] %v2097_v4  ;;  %435 = vst [vmem:[#allocation2 + $0x78] sm:$0xff] %v2097_v4 }
  0x8c PF: > { %v1881_v5 = vld [vmem:[%s2350_s19] sm:$0xff]   ;;  %v1882_v6 = vld [vmem:[%s2350_s19 + $0x8] sm:$0xff]   ;;  %v1883_v7 = vld [vmem:[%s2350_s19 + $0x10] sm:$0xff]   ;;  %p1484_p1 = scmp.ne.s32.totalorder %s2073_s26, 1 }
  0x8d   : > { %1645 = vmatprep.subr.bf16.mxu0 %v1881_v5  ;;  %1741 = vmatprep.subr.bf16.mxu1 %v1881_v5  ;;  %v1884_v8 = vld [vmem:[%s2350_s19 + $0x18] sm:$0xff]   ;;  %v436_v9 = vld [vmem:[%s2332_s9] sm:$0xff]  ;;  %v438_v10 = vld [vmem:[%s2332_s9 + $0x10] sm:$0xff]  ;;  %s2549_s8 = sld [smem:[#allocation21_spill]] (!%p1484_p1) }
  0x8e   : > { %1646 = vmatpush3.bf16.msra.mxu0 %v1881_v5  ;;  %1749 = vmatpush3.bf16.msra.mxu1 %v1881_v5  ;;  %v440_v11 = vunpack.c.l.s8.bf16 %v436_v9  ;;  %v444_v12 = vunpack.c.l.s8.bf16 %v438_v10  ;;  %v1885_v13 = vld [vmem:[%s2350_s19 + $0x20] sm:$0xff]   ;;  %v1886_v14 = vld [vmem:[%s2350_s19 + $0x28] sm:$0xff]   ;;  %v1887_v15 = vld [vmem:[%s2350_s19 + $0x30] sm:$0xff]   ;;  %v441_v19 = vunpack.c.h.s8.bf16 %v436_v9  ;;  %v445_v20 = vunpack.c.h.s8.bf16 %v438_v10 }
  0x8f   : > { %1647 = vmatprep.subr.bf16.mxu0 %v1882_v6  ;;  %1742 = vmatprep.subr.bf16.mxu1 %v1882_v6  ;;  %v1888_v16 = vld [vmem:[%s2350_s19 + $0x38] sm:$0xff]   ;;  %v437_v17 = vld [vmem:[%s2332_s9 + $0x8] sm:$0xff]  ;;  %v450_v25 = vld [vmem:[#allocation2 + $0x10] sm:$0xff] }
  0x90   : > { %1661 = vmatprep.mubr.bf16.mxu0 %v440_v11  ;;  %1669 = vmatprep.mubr.bf16.mxu1 %v444_v12  ;;  %v439_v18 = vld [vmem:[%s2332_s9 + $0x18] sm:$0xff]  ;;  %v442_v21 = vunpack.c.l.s8.bf16 %v437_v17  ;;  %v443_v23 = vunpack.c.h.s8.bf16 %v437_v17  ;;  %v448_v27 = vld [vmem:[#allocation2] sm:$0xff]  ;;  %v449_v37 = vld [vmem:[#allocation2 + $0x8] sm:$0xff]  ;;  %v2098_v11 = vmov (!%p1484_p1), 0  }
  0x91   : > { %v446_v22 = vunpack.c.l.s8.bf16 %v439_v18  ;;  %v447_v24 = vunpack.c.h.s8.bf16 %v439_v18  ;;  %v458_v26 = vld [vmem:[#allocation2 + $0x50] sm:$0xff]  ;;  %v456_v28 = vld [vmem:[#allocation2 + $0x40] sm:$0xff]  ;;  %v451_v31 = vld [vmem:[#allocation2 + $0x18] sm:$0xff]  ;;  %1890 = vset.pattern.permute.xlu1 (!%p1484_p1), %v2098_v11  ;;  %1889 = vset.pattern.permute.xlu0 (!%p1484_p1), %v2098_v11 }
  0x92   : > { %1648 = vmatpush3.bf16.msra.mxu0 %v1882_v6  ;;  %1750 = vmatpush3.bf16.msra.mxu1 %v1882_v6  ;;  %v459_v32 = vld [vmem:[#allocation2 + $0x58] sm:$0xff]  ;;  %v457_v38 = vld [vmem:[#allocation2 + $0x48] sm:$0xff]  ;;  %v454_v49 = vld [vmem:[#allocation2 + $0x30] sm:$0xff] }
  0x93   : > { %1649 = vmatprep.subr.bf16.mxu0 %v1883_v7  ;;  %1743 = vmatprep.subr.bf16.mxu1 %v1883_v7  ;;  %v462_v50 = vld [vmem:[#allocation2 + $0x70] sm:$0xff]  ;;  %v452_v51 = vld [vmem:[#allocation2 + $0x20] sm:$0xff]  ;;  %v455_v55 = vld [vmem:[#allocation2 + $0x38] sm:$0xff] }
  0x94   : > { %v460_v52 = vld [vmem:[#allocation2 + $0x60] sm:$0xff]  ;;  %v463_v56 = vld [vmem:[#allocation2 + $0x78] sm:$0xff]  ;;  %v453_v61 = vld [vmem:[#allocation2 + $0x28] sm:$0xff] }
  0x95   : > { %v461_v62 = vld [vmem:[#allocation2 + $0x68] sm:$0xff]  ;;  %v679_v9 = vld [vmem:[%s2355_s16 + $0x10] sm:$0xff] (!%p1484_p1)  ;;  %v677_v10 = vld [vmem:[%s2355_s16] sm:$0xff] (!%p1484_p1) }
  0x96   : > { %1650 = vmatpush3.bf16.msra.mxu0 %v1883_v7  ;;  %1751 = vmatpush3.bf16.msra.mxu1 %v1883_v7  ;;  %v680_v12 = vld [vmem:[%s2355_s16 + $0x18] sm:$0xff] (!%p1484_p1)  ;;  %v1892_v17 = vld [vmem:[#allocation7] sm:$0xff] (!%p1484_p1)   ;;  %v1893_v18 = vld [vmem:[#allocation7 + $0x48] sm:$0xff] (!%p1484_p1)  }
  0x97   : > { %1651 = vmatprep.subr.bf16.mxu0 %v1884_v8  ;;  %1744 = vmatprep.subr.bf16.mxu1 %v1884_v8 }
  0x98   : > { %705 = vperm.xlu1 (!%p1484_p1), %1890, %v679_v9   ;;  %695 = vperm.xlu0 (!%p1484_p1), %1889, %v677_v10  }
  0x9a   : > { %1652 = vmatpush3.bf16.msra.mxu0 %v1884_v8  ;;  %1752 = vmatpush3.bf16.msra.mxu1 %v1884_v8 }
  0x9b   : > { %1653 = vmatprep.subr.bf16.mxu0 %v1885_v13  ;;  %1745 = vmatprep.subr.bf16.mxu1 %v1885_v13 }
  0x9c   : > { %710 = vperm.xlu1 (!%p1484_p1), %1890, %v680_v12  }
  0x9e   : > { %1654 = vmatpush3.bf16.msra.mxu0 %v1885_v13  ;;  %1753 = vmatpush3.bf16.msra.mxu1 %v1885_v13  ;;  %v678_v13 = vld [vmem:[%s2355_s16 + $0x8] sm:$0xff] (!%p1484_p1) }
  0x9f   : > { %1655 = vmatprep.subr.bf16.mxu0 %v1886_v14  ;;  %1746 = vmatprep.subr.bf16.mxu1 %v1886_v14 }
  0xa0   : > { %700 = vperm.xlu0 (!%p1484_p1), %1889, %v678_v13  }
  0xa2   : > { %1656 = vmatpush3.bf16.msra.mxu0 %v1886_v14  ;;  %1754 = vmatpush3.bf16.msra.mxu1 %v1886_v14  ;;  %v682_v14 = vld [vmem:[%s2355_s16 + $0x28] sm:$0xff] (!%p1484_p1) }
  0xa3   : > { %1657 = vmatprep.subr.bf16.mxu0 %v1887_v15  ;;  %1747 = vmatprep.subr.bf16.mxu1 %v1887_v15 }
  0xa4   : > { %720 = vperm.xlu1 (!%p1484_p1), %1890, %v682_v14  }
  0xa6   : > { %1658 = vmatpush3.bf16.msra.mxu0 %v1887_v15  ;;  %1755 = vmatpush3.bf16.msra.mxu1 %v1887_v15  ;;  %v681_v15 = vld [vmem:[%s2355_s16 + $0x20] sm:$0xff] (!%p1484_p1) }
  0xa7   : > { %1659 = vmatprep.subr.bf16.mxu0 %v1888_v16  ;;  %1748 = vmatprep.subr.bf16.mxu1 %v1888_v16 }
  0xa8   : > { %715 = vperm.xlu0 (!%p1484_p1), %1889, %v681_v15  }
  0xaa   : > { %1660 = vmatpush3.bf16.msra.mxu0 %v1888_v16  ;;  %1756 = vmatpush3.bf16.msra.mxu1 %v1888_v16  ;;  %v1891_v16 = vld [vmem:[#allocation7 + $0x40] sm:$0xff] (!%p1484_p1)  }
  0xab   : > { %1677 = vmatprep.subr.bf16.mxu1 (!%p1484_p1), %v1891_v16  ;;  %1709 = vmatprep.subr.bf16.mxu0 (!%p1484_p1), %v1892_v17 }
  0xad   : > { %1662 = vmatmul.mubr.bf16.vlgmr.msra.gmra.mrb[0].mxu0 %v441_v19  ;;  %1670 = vmatmul.mubr.bf16.vlgmr.msra.gmra.mrb[0].mxu1 %v445_v20  ;;  %v684_v19 = vld [vmem:[%s2355_s16 + $0x38] sm:$0xff] (!%p1484_p1)  ;;  %v1894_v20 = vld [vmem:[#allocation7 + $0x8] sm:$0xff] (!%p1484_p1)  }
  0xae   : > { %1665 = vmatprep.mubr.bf16.mxu0 %v442_v21  ;;  %1673 = vmatprep.mubr.bf16.mxu1 %v446_v22  ;;  %v683_v21 = vld [vmem:[%s2355_s16 + $0x30] sm:$0xff] (!%p1484_p1) }
  0xaf   : > { %1678 = vmatpush3.bf16.msra.mxu1 (!%p1484_p1), %v1891_v16  ;;  %1710 = vmatpush3.bf16.msra.mxu0 (!%p1484_p1), %v1892_v17  ;;  %v1895_v22 = vld [vmem:[#allocation7 + $0x50] sm:$0xff] (!%p1484_p1)  }
  0xb0   : > { %1679 = vmatprep.subr.bf16.mxu1 (!%p1484_p1), %v1893_v18  ;;  %1711 = vmatprep.subr.bf16.mxu0 (!%p1484_p1), %v1894_v20 }
  0xb1   : > { %730 = vperm.xlu1 (!%p1484_p1), %1890, %v684_v19   ;;  %725 = vperm.xlu0 (!%p1484_p1), %1889, %v683_v21  }
  0xb3   : > { %1680 = vmatpush3.bf16.msra.mxu1 (!%p1484_p1), %v1893_v18  ;;  %1712 = vmatpush3.bf16.msra.mxu0 (!%p1484_p1), %v1894_v20 }
  0xb4   : > { %1681 = vmatprep.subr.bf16.mxu1 (!%p1484_p1), %v1895_v22 }
  0xb5   : > { %1666 = vmatmul.mubr.bf16.gmra.mrb[4].mxu0 %v443_v23  ;;  %1674 = vmatmul.mubr.bf16.gmra.mrb[4].mxu1 %v447_v24  ;;  %v1896_v23 = vld [vmem:[#allocation7 + $0x10] sm:$0xff] (!%p1484_p1)   ;;  %v686_v24 = vld [vmem:[%s2355_s16 + $0x48] sm:$0xff] (!%p1484_p1) }
  0xb6   : > { %1713 = vmatprep.subr.bf16.mxu0 (!%p1484_p1), %v1896_v23  ;;  %740 = vperm.xlu1 (!%p1484_p1), %1890, %v686_v24  }
  0xb7   : > { %1682 = vmatpush3.bf16.msra.mxu1 (!%p1484_p1), %v1895_v22  ;;  %1714 = vmatpush3.bf16.msra.mxu0 (!%p1484_p1), %v1896_v23 }
 0x180   : > { %v1663_v29 = vpop.f32.mrb[0].mxu0  ;;  %v1671_v30 = vpop.f32.mrb[0].mxu1 }
 0x181   : > { %v627_v33 = vadd.f32 %v1663_v29, %v450_v25  ;;  %v635_v34 = vadd.f32 %v1671_v30, %v458_v26  ;;  %v562_v35 = vpop.f32.mrb[1].mxu0  ;;  %v594_v36 = vpop.f32.mrb[1].mxu1  ;;  %v685_v25 = vld [vmem:[%s2355_s16 + $0x40] sm:$0xff] (!%p1484_p1)  ;;  %v1897_v26 = vld [vmem:[#allocation7 + $0x58] sm:$0xff] (!%p1484_p1)   ;;  %v687_v29 = vld [vmem:[%s2355_s16 + $0x50] sm:$0xff] (!%p1484_p1) }
 0x182   : > { %v625_v39 = vadd.f32 %v562_v35, %v448_v27  ;;  %v633_v40 = vadd.f32 %v594_v36, %v456_v28  ;;  %v1664_v41 = vpop.f32.mrb[2].mxu0  ;;  %v1672_v42 = vpop.f32.mrb[2].mxu1  ;;  %v1898_v27 = vld [vmem:[#allocation7 + $0x18] sm:$0xff] (!%p1484_p1)   ;;  %735 = vperm.xlu0 (!%p1484_p1), %1889, %v685_v25   ;;  %1683 = vmatprep.subr.bf16.mxu1 (!%p1484_p1), %v1897_v26  ;;  %v1899_v30 = vld [vmem:[#allocation7 + $0x60] sm:$0xff] (!%p1484_p1)   ;;  %v1901_v35 = vld [vmem:[#allocation7 + $0x68] sm:$0xff] (!%p1484_p1)  }
 0x183   : > { %643 = vst [vmem:[#allocation2 + $0x10] sm:$0xff] %v627_v33  ;;  %651 = vst [vmem:[#allocation2 + $0x50] sm:$0xff] %v635_v34  ;;  %v628_v43 = vadd.f32 %v1664_v41, %v451_v31  ;;  %v636_v44 = vadd.f32 %v1672_v42, %v459_v32  ;;  %v565_v45 = vpop.f32.mrb[3].mxu0  ;;  %v597_v46 = vpop.f32.mrb[3].mxu1  ;;  %v688_v28 = vld [vmem:[%s2355_s16 + $0x58] sm:$0xff] (!%p1484_p1)  ;;  %1715 = vmatprep.subr.bf16.mxu0 (!%p1484_p1), %v1898_v27  ;;  %v1900_v31 = vld [vmem:[#allocation7 + $0x20] sm:$0xff] (!%p1484_p1)   ;;  %1684 = vmatpush3.bf16.msra.mxu1 (!%p1484_p1), %v1897_v26 }
 0x184   : > { %641 = vst [vmem:[#allocation2] sm:$0xff] %v625_v39  ;;  %649 = vst [vmem:[#allocation2 + $0x40] sm:$0xff] %v633_v40  ;;  %v626_v47 = vadd.f32 %v565_v45, %v449_v37  ;;  %v634_v48 = vadd.f32 %v597_v46, %v457_v38  ;;  %v690_v32 = vld [vmem:[%s2355_s16 + $0x68] sm:$0xff] (!%p1484_p1)  ;;  %v689_v33 = vld [vmem:[%s2355_s16 + $0x60] sm:$0xff] (!%p1484_p1)  ;;  %750 = vperm.xlu1 (!%p1484_p1), %1890, %v688_v28   ;;  %1685 = vmatprep.subr.bf16.mxu1 (!%p1484_p1), %v1899_v30 }
 0x185   : > { %644 = vst [vmem:[#allocation2 + $0x18] sm:$0xff] %v628_v43  ;;  %652 = vst [vmem:[#allocation2 + $0x58] sm:$0xff] %v636_v44  ;;  %v1906_v34 = vld [vmem:[%s2335_s20] sm:$0xff] (!%p1484_p1)   ;;  %1716 = vmatpush3.bf16.msra.mxu0 (!%p1484_p1), %v1898_v27  ;;  %v1902_v36 = vld [vmem:[#allocation7 + $0x28] sm:$0xff] (!%p1484_p1)  }
 0x186   : > { %642 = vst [vmem:[#allocation2 + $0x8] sm:$0xff] %v626_v47  ;;  %650 = vst [vmem:[#allocation2 + $0x48] sm:$0xff] %v634_v48  ;;  %745 = vperm.xlu0 (!%p1484_p1), %1889, %v687_v29   ;;  %1717 = vmatprep.subr.bf16.mxu0 (!%p1484_p1), %v1900_v31  ;;  %v692_v37 = vld [vmem:[%s2355_s16 + $0x78] sm:$0xff] (!%p1484_p1)  ;;  %v691_v38 = vld [vmem:[%s2355_s16 + $0x70] sm:$0xff] (!%p1484_p1) }
 0x187   : > { %1693 = vmatprep.mubr.bf16.mxu1 (!%p1484_p1), %v1906_v34  ;;  %1686 = vmatpush3.bf16.msra.mxu1 (!%p1484_p1), %v1899_v30  ;;  %v1903_v39 = vld [vmem:[#allocation7 + $0x70] sm:$0xff] (!%p1484_p1)   ;;  %v1905_v41 = vld [vmem:[#allocation7 + $0x78] sm:$0xff] (!%p1484_p1)   ;;  %v1908_v43 = vld [vmem:[%s2335_s20 + $0x8] sm:$0xff] (!%p1484_p1)  }
 0x188   : > { %v1667_v53 = vpop.f32.mrb[4].mxu0  ;;  %v1675_v54 = vpop.f32.mrb[4].mxu1  ;;  %660 = sbr.rel (%p1484_p1) target bundleno = 754 (0x2f2), region = 98  ;;  %760 = vperm.xlu1 (!%p1484_p1), %1890, %v690_v32   ;;  %1687 = vmatprep.subr.bf16.mxu1 (!%p1484_p1), %v1901_v35  ;;  %v1904_v40 = vld [vmem:[#allocation7 + $0x30] sm:$0xff] (!%p1484_p1)   ;;  %v1907_v42 = vld [vmem:[#allocation7 + $0x38] sm:$0xff] (!%p1484_p1)   ;;  %v1911_v46 = vld [vmem:[%s2335_s20 + $0x20] sm:$0xff] (!%p1484_p1)  }
 0x189   : > { %v631_v57 = vadd.f32 %v1667_v53, %v454_v49  ;;  %v639_v58 = vadd.f32 %v1675_v54, %v462_v50  ;;  %v578_v59 = vpop.f32.mrb[5].mxu0  ;;  %v610_v60 = vpop.f32.mrb[5].mxu1  ;;  %1718 = vmatpush3.bf16.msra.mxu0 (!%p1484_p1), %v1900_v31  ;;  %v1909_v44 = vld [vmem:[%s2335_s20 + $0x10] sm:$0xff] (!%p1484_p1)   ;;  %v1910_v45 = vld [vmem:[%s2335_s20 + $0x18] sm:$0xff] (!%p1484_p1)   ;;  %v1912_v47 = vld [vmem:[%s2335_s20 + $0x28] sm:$0xff] (!%p1484_p1)  }
 0x18a   : > { %v629_v63 = vadd.f32 %v578_v59, %v452_v51  ;;  %v637_v0 = vadd.f32 %v610_v60, %v460_v52  ;;  %v1668_v1 = vpop.f32.mrb[6].mxu0  ;;  %v1676_v2 = vpop.f32.mrb[6].mxu1  ;;  %755 = vperm.xlu0 (!%p1484_p1), %1889, %v689_v33   ;;  %1719 = vmatprep.subr.bf16.mxu0 (!%p1484_p1), %v1902_v36  ;;  %v1913_v48 = vld [vmem:[%s2335_s20 + $0x30] sm:$0xff] (!%p1484_p1)   ;;  %v1914_v49 = vld [vmem:[%s2335_s20 + $0x38] sm:$0xff] (!%p1484_p1)  }
 0x18b   : > { %647 = vst [vmem:[#allocation2 + $0x30] sm:$0xff] %v631_v57  ;;  %655 = vst [vmem:[#allocation2 + $0x70] sm:$0xff] %v639_v58  ;;  %v632_v3 = vadd.f32 %v1668_v1, %v455_v55  ;;  %v640_v4 = vadd.f32 %v1676_v2, %v463_v56  ;;  %v581_v5 = vpop.f32.mrb[7].mxu0  ;;  %v613_v6 = vpop.f32.mrb[7].mxu1  ;;  %1688 = vmatpush3.bf16.msra.mxu1 (!%p1484_p1), %v1901_v35  ;;  %v663_v52 = vld [vmem:[#allocation2 + $0x10] sm:$0xff] (!%p1484_p1)  ;;  %v661_v53 = vld [vmem:[#allocation2] sm:$0xff] (!%p1484_p1) }
 0x18c   : > { %645 = vst [vmem:[#allocation2 + $0x20] sm:$0xff] %v629_v63  ;;  %653 = vst [vmem:[#allocation2 + $0x60] sm:$0xff] %v637_v0  ;;  %v630_v7 = vadd.f32 %v581_v5, %v453_v61  ;;  %v638_v8 = vadd.f32 %v613_v6, %v461_v62  ;;  %770 = vperm.xlu1 (!%p1484_p1), %1890, %v692_v37   ;;  %1689 = vmatprep.subr.bf16.mxu1 (!%p1484_p1), %v1903_v39  ;;  %v706_v50 = vpop.permute.xlu1 (!%p1484_p1), %705  ;;  %v696_v51 = vpop.permute.xlu0 (!%p1484_p1), %695  ;;  %v664_v54 = vld [vmem:[#allocation2 + $0x18] sm:$0xff] (!%p1484_p1)  ;;  %v669_v14 = vld [vmem:[#allocation2 + $0x40] sm:$0xff] (!%p1484_p1) }
 0x18d   : > { %648 = vst [vmem:[#allocation2 + $0x38] sm:$0xff] %v632_v3  ;;  %656 = vst [vmem:[#allocation2 + $0x78] sm:$0xff] %v640_v4  ;;  %1720 = vmatpush3.bf16.msra.mxu0 (!%p1484_p1), %v1902_v36  ;;  %v662_v55 = vld [vmem:[#allocation2 + $0x8] sm:$0xff] (!%p1484_p1)  ;;  %v775_v58 = vmul.f32 (!%p1484_p1), %v706_v50, %v663_v52  ;;  %v773_v59 = vmul.f32 (!%p1484_p1), %v696_v51, %v661_v53  ;;  %v672_v20 = vld [vmem:[#allocation2 + $0x58] sm:$0xff] (!%p1484_p1) }
 0x18e   : > { %646 = vst [vmem:[#allocation2 + $0x28] sm:$0xff] %v630_v7  ;;  %654 = vst [vmem:[#allocation2 + $0x68] sm:$0xff] %v638_v8  ;;  %765 = vperm.xlu0 (!%p1484_p1), %1889, %v691_v38   ;;  %1721 = vmatprep.subr.bf16.mxu0 (!%p1484_p1), %v1904_v40  ;;  %v670_v13 = vld [vmem:[#allocation2 + $0x48] sm:$0xff] (!%p1484_p1)  ;;  %v671_v21 = vld [vmem:[#allocation2 + $0x50] sm:$0xff] (!%p1484_p1) }
 0x18f   : > { %1690 = vmatpush3.bf16.msra.mxu1 %v1903_v39 }
 0x190   : > { %1691 = vmatprep.subr.bf16.mxu1 %v1905_v41  ;;  %v711_v56 = vpop.permute.xlu1 %710  ;;  %v701_v57 = vpop.permute.xlu0 %700 }
 0x191   : > { %1722 = vmatpush3.bf16.msra.mxu0 %v1904_v40  ;;  %v776_v60 = vmul.f32 %v711_v56, %v664_v54  ;;  %v774_v61 = vmul.f32 %v701_v57, %v662_v55 }
 0x192   : > { %1723 = vmatprep.subr.bf16.mxu0 %v1907_v42  ;;  %v667_v7 = vld [vmem:[#allocation2 + $0x30] sm:$0xff] }
 0x193   : > { %1692 = vmatpush3.bf16.msra.mxu1 %v1905_v41  ;;  %v665_v63 = vld [vmem:[#allocation2 + $0x20] sm:$0xff]  ;;  %v790_v0 = vpack.c.bf16 %v776_v60, %v775_v58  ;;  %v789_v1 = vpack.c.bf16 %v774_v61, %v773_v59  ;;  %v675_v35 = vld [vmem:[#allocation2 + $0x70] sm:$0xff] }
 0x194   : > { %v721_v2 = vpop.permute.xlu1 %720  ;;  %v716_v3 = vpop.permute.xlu0 %715  ;;  %v668_v6 = vld [vmem:[#allocation2 + $0x38] sm:$0xff]  ;;  %v673_v28 = vld [vmem:[#allocation2 + $0x60] sm:$0xff] }
 0x195   : > { %1724 = vmatpush3.bf16.msra.mxu0 %v1907_v42  ;;  %v666_v62 = vld [vmem:[#allocation2 + $0x28] sm:$0xff]  ;;  %v777_v5 = vmul.f32 %v716_v3, %v665_v63  ;;  %1725 = vmatprep.mubr.bf16.mxu0 %v789_v1  ;;  %v676_v34 = vld [vmem:[#allocation2 + $0x78] sm:$0xff]  ;;  %v2408_v59 = vld [vmem:[%s2549_s8] ss:$0 sm:$0xff] }
 0x196   : > { %1694 = vmatmul.mubr.bf16.vlgmr.msra.gmra.mrb[0].mxu1 %v1908_v43  ;;  %v778_v4 = vmul.f32 %v721_v2, %v666_v62  ;;  %v674_v27 = vld [vmem:[#allocation2 + $0x68] sm:$0xff] }
 0x197   : > { %1697 = vmatprep.mubr.bf16.mxu1 %v1909_v44 }
 0x198   : > { %1726 = vmatmul.mubr.bf16.vlgmr.msra.gmra.mrb[0].mxu0 %v790_v0  ;;  %v791_v8 = vpack.c.bf16 %v778_v4, %v777_v5  ;;  %v731_v9 = vpop.permute.xlu1 %730  ;;  %v726_v10 = vpop.permute.xlu0 %725 }
 0x199   : > { %v780_v11 = vmul.f32 %v731_v9, %v668_v6  ;;  %v779_v12 = vmul.f32 %v726_v10, %v667_v7 }
 0x19a   : > { %1729 = vmatprep.mubr.bf16.mxu0 %v791_v8 }
 0x19b   : > { %v792_v15 = vpack.c.bf16 %v780_v11, %v779_v12 }
 0x19c   : > { %v741_v16 = vpop.permute.xlu1 %740 }
 0x19d   : > { %v782_v18 = vmul.f32 %v741_v16, %v670_v13 }
 0x19e   : > { %1698 = vmatmul.mubr.bf16.gmra.mrb[4].mxu1 %v1910_v45 }
 0x19f   : > { %1701 = vmatprep.mubr.bf16.mxu1 %v1911_v46 }
 0x1a0   : > { %1730 = vmatmul.mubr.bf16.gmra.mrb[4].mxu0 %v792_v15 }
 0x1a6   : > { %1702 = vmatmul.mubr.bf16.gmra.mrb[8].mxu1 %v1912_v47 }
 0x1a7   : > { %1705 = vmatprep.mubr.bf16.mxu1 %v1913_v48 }
 0x1ae   : > { %1706 = vmatmul.mubr.bf16.gmra.mrb[12].mxu1 %v1914_v49 }
 0x201   : > { %v736_v17 = vpop.permute.xlu0 %735 }
 0x202   : > { %v781_v19 = vmul.f32 %v736_v17, %v669_v14 }
 0x203   : > { %v751_v23 = vpop.permute.xlu1 %750 }
 0x204   : > { %v793_v22 = vpack.c.bf16 %v782_v18, %v781_v19  ;;  %v784_v25 = vmul.f32 %v751_v23, %v672_v20 }
 0x205   : > { %v746_v24 = vpop.permute.xlu0 %745 }
 0x206   : > { %v783_v26 = vmul.f32 %v746_v24, %v671_v21  ;;  %1733 = vmatprep.mubr.bf16.mxu0 %v793_v22 }
 0x207   : > { %v761_v30 = vpop.permute.xlu1 %760 }
 0x208   : > { %v794_v29 = vpack.c.bf16 %v784_v25, %v783_v26  ;;  %v786_v32 = vmul.f32 %v761_v30, %v674_v27 }
 0x209   : > { %v756_v31 = vpop.permute.xlu0 %755 }
 0x20a   : > { %v785_v33 = vmul.f32 %v756_v31, %v673_v28  ;;  %1734 = vmatmul.mubr.bf16.gmra.mrb[8].mxu0 %v794_v29 }
 0x20b   : > { %v771_v37 = vpop.permute.xlu1 %770 }
 0x20c   : > { %v795_v36 = vpack.c.bf16 %v786_v32, %v785_v33  ;;  %v788_v39 = vmul.f32 %v771_v37, %v676_v34 }
 0x20d   : > { %v766_v38 = vpop.permute.xlu0 %765 }
 0x20e   : > { %v787_v40 = vmul.f32 %v766_v38, %v675_v35  ;;  %1737 = vmatprep.mubr.bf16.mxu0 %v795_v36 }
 0x210   : > { %v796_v41 = vpack.c.bf16 %v788_v39, %v787_v40 }
 0x212   : > { %1738 = vmatmul.mubr.bf16.gmra.mrb[12].mxu0 %v796_v41 }
 0x269   : > { %v1695_v42 = vpop.f32.mrb[0].mxu1 }
 0x26a   : > { %v975_v43 = vpop.f32.mrb[1].mxu1 }
 0x26b   : > { %v1696_v44 = vpop.f32.mrb[2].mxu1  ;;  %v1727_v58 = vpop.f32.mrb[0].mxu0 }
 0x26c   : > { %v978_v45 = vpop.f32.mrb[3].mxu1  ;;  %v1129_v60 = vadd.f32 %v1727_v58, %v1695_v42  ;;  %v1120_v61 = vpop.f32.mrb[1].mxu0 }
 0x26d   : > { %v1121_v62 = vadd.f32 %v1120_v61, %v975_v43  ;;  %v1728_v63 = vpop.f32.mrb[2].mxu0 }
 0x26e   : > { %v1192_v0 = vadd.f32 %v2408_v59, %v1129_v60  ;;  %v1132_v1 = vadd.f32 %v1728_v63, %v1696_v44  ;;  %v1123_v2 = vpop.f32.mrb[3].mxu0 }
 0x26f   : > { %v1190_v3 = vadd.f32 %v2408_v59, %v1121_v62  ;;  %v1124_v4 = vadd.f32 %v1123_v2, %v978_v45 }
 0x270   : > { %v1193_v5 = vadd.f32 %v2408_v59, %v1132_v1  ;;  %v1208_v7 = vmax.f32 %v1192_v0, 0.0 }
 0x271   : > { %v1699_v46 = vpop.f32.mrb[4].mxu1  ;;  %v1191_v6 = vadd.f32 %v2408_v59, %v1124_v4  ;;  %v1206_v9 = vmax.f32 %v1190_v3, 0.0 }
 0x272   : > { %v991_v47 = vpop.f32.mrb[5].mxu1  ;;  %v1209_v8 = vmax.f32 %v1193_v5, 0.0 }
 0x273   : > { %v1700_v48 = vpop.f32.mrb[6].mxu1  ;;  %v1207_v10 = vmax.f32 %v1191_v6, 0.0  ;;  %v1731_v11 = vpop.f32.mrb[4].mxu0 }
 0x274   : > { %v994_v49 = vpop.f32.mrb[7].mxu1  ;;  %v1558_v12 = vpack.c.bf16 %v1209_v8, %v1208_v7  ;;  %v1145_v13 = vadd.f32 %v1731_v11, %v1699_v46  ;;  %v1136_v14 = vpop.f32.mrb[5].mxu0 }
 0x275   : > { %v1553_v15 = vpack.c.bf16 %v1207_v10, %v1206_v9  ;;  %v1137_v16 = vadd.f32 %v1136_v14, %v991_v47  ;;  %v1732_v17 = vpop.f32.mrb[6].mxu0 }
 0x276   : > { %1590 = vst [vmem:[%s2357_s10 + $0x8] sm:$0xff] %v1558_v12   ;;  %v1196_v18 = vadd.f32 %v2408_v59, %v1145_v13  ;;  %v1148_v19 = vadd.f32 %v1732_v17, %v1700_v48  ;;  %v1139_v20 = vpop.f32.mrb[7].mxu0 }
 0x277   : > { %1554 = vst [vmem:[%s2357_s10] sm:$0xff] %v1553_v15   ;;  %v1194_v21 = vadd.f32 %v2408_v59, %v1137_v16  ;;  %v1140_v22 = vadd.f32 %v1139_v20, %v994_v49 }
 0x278   : > { %v1197_v23 = vadd.f32 %v2408_v59, %v1148_v19  ;;  %v1212_v25 = vmax.f32 %v1196_v18, 0.0 }
 0x279   : > { %v1703_v50 = vpop.f32.mrb[8].mxu1  ;;  %v1195_v24 = vadd.f32 %v2408_v59, %v1140_v22  ;;  %v1210_v27 = vmax.f32 %v1194_v21, 0.0 }
 0x27a   : > { %v1007_v51 = vpop.f32.mrb[9].mxu1  ;;  %v1213_v26 = vmax.f32 %v1197_v23, 0.0 }
 0x27b   : > { %v1704_v52 = vpop.f32.mrb[10].mxu1  ;;  %v1211_v28 = vmax.f32 %v1195_v24, 0.0 }
 0x27c   : > { %v1010_v53 = vpop.f32.mrb[11].mxu1  ;;  %v1568_v30 = vpack.c.bf16 %v1213_v26, %v1212_v25 }
 0x27d   : > { %v1563_v33 = vpack.c.bf16 %v1211_v28, %v1210_v27 }
 0x27e   : > { %1592 = vst [vmem:[%s2357_s10 + $0x18] sm:$0xff] %v1568_v30  }
 0x27f   : > { %1591 = vst [vmem:[%s2357_s10 + $0x10] sm:$0xff] %v1563_v33  }
 0x281   : > { %v2397_v54 = vpop.f32.mrb[12].mxu1 }
 0x282   : > { %v2399_v55 = vpop.f32.mrb[13].mxu1 }
 0x283   : > { %v2401_v56 = vpop.f32.mrb[14].mxu1 }
 0x284   : > { %v2403_v57 = vpop.f32.mrb[15].mxu1 }
 0x2dd   : > { %v1735_v29 = vpop.f32.mrb[8].mxu0 }
 0x2de   : > { %v1161_v31 = vadd.f32 %v1735_v29, %v1703_v50  ;;  %v1152_v32 = vpop.f32.mrb[9].mxu0 }
 0x2df   : > { %v1153_v34 = vadd.f32 %v1152_v32, %v1007_v51  ;;  %v1736_v35 = vpop.f32.mrb[10].mxu0 }
 0x2e0   : > { %v1200_v36 = vadd.f32 %v2408_v59, %v1161_v31  ;;  %v1164_v37 = vadd.f32 %v1736_v35, %v1704_v52  ;;  %v1155_v38 = vpop.f32.mrb[11].mxu0 }
 0x2e1   : > { %v1198_v39 = vadd.f32 %v2408_v59, %v1153_v34  ;;  %v1156_v40 = vadd.f32 %v1155_v38, %v1010_v53 }
 0x2e2   : > { %v1201_v41 = vadd.f32 %v2408_v59, %v1164_v37  ;;  %v1216_v43 = vmax.f32 %v1200_v36, 0.0 }
 0x2e3   : > { %v1199_v42 = vadd.f32 %v2408_v59, %v1156_v40  ;;  %v1214_v45 = vmax.f32 %v1198_v39, 0.0 }
 0x2e4   : > { %v1217_v44 = vmax.f32 %v1201_v41, 0.0 }
 0x2e5   : > { %v1215_v46 = vmax.f32 %v1199_v42, 0.0  ;;  %v1739_v47 = vpop.f32.mrb[12].mxu0 }
 0x2e6   : > { %v1578_v48 = vpack.c.bf16 %v1217_v44, %v1216_v43  ;;  %v1177_v49 = vadd.f32 %v1739_v47, %v2397_v54  ;;  %v1168_v50 = vpop.f32.mrb[13].mxu0 }
 0x2e7   : > { %v1573_v51 = vpack.c.bf16 %v1215_v46, %v1214_v45  ;;  %v1169_v52 = vadd.f32 %v1168_v50, %v2399_v55  ;;  %v1740_v58 = vpop.f32.mrb[14].mxu0 }
 0x2e8   : > { %1594 = vst [vmem:[%s2357_s10 + $0x28] sm:$0xff] %v1578_v48   ;;  %v1204_v53 = vadd.f32 %v2408_v59, %v1177_v49  ;;  %v1180_v60 = vadd.f32 %v1740_v58, %v2401_v56  ;;  %v1171_v61 = vpop.f32.mrb[15].mxu0 }
 0x2e9   : > { %1593 = vst [vmem:[%s2357_s10 + $0x20] sm:$0xff] %v1573_v51   ;;  %v1202_v62 = vadd.f32 %v2408_v59, %v1169_v52  ;;  %v1172_v63 = vadd.f32 %v1171_v61, %v2403_v57 }
 0x2ea   : > { %v1205_v54 = vadd.f32 %v2408_v59, %v1180_v60  ;;  %v1220_v1 = vmax.f32 %v1204_v53, 0.0 }
 0x2eb   : > { %v1203_v0 = vadd.f32 %v2408_v59, %v1172_v63  ;;  %v1218_v2 = vmax.f32 %v1202_v62, 0.0 }
 0x2ec   : > { %v1221_v55 = vmax.f32 %v1205_v54, 0.0 }
 0x2ed   : > { %v1219_v3 = vmax.f32 %v1203_v0, 0.0 }
 0x2ee   : > { %v1588_v4 = vpack.c.bf16 %v1221_v55, %v1220_v1 }
 0x2ef   : > { %v1583_v5 = vpack.c.bf16 %v1219_v3, %v1218_v2 }
 0x2f0   : > { %1596 = vst [vmem:[%s2357_s10 + $0x38] sm:$0xff] %v1588_v4  }
 0x2f1   : > { %1595 = vst [vmem:[%s2357_s10 + $0x30] sm:$0xff] %v1583_v5  }
 0x2f2 PF: > { %s2550_s14 = sld [smem:[#allocation18_spill]]  ;;  %s1549_s9 = sshll.u32 %s2077_s27, 10 }
 0x2f3   : > { %s2551_s24 = sld [smem:[#allocation22_spill]]  ;;  %s1316_s5 = sshll.u32 %s2357_s10, 4  ;;  %s2445_s5 = int_to_ptr.vmem [resolvable:$true] %s1316_s5 }
 0x2f4   : > { %s1303_s21 = scalar_lea.sflag [#allocation6], %s2329_s11  ;;  %s1971_s19 = scalar_lea.vmem %s2445_s5, 1024 }
 0x2f5   : > { %p1972_p2 = scmp.ne.s32.totalorder %s2445_s5, %s1971_s19  ;;  %s2099_s3 = smov [#allocation9]  }
 0x2f6   : > { %s1975_s17 = sshll.u32 %s2099_s3, 4  ;;  %s1976_s17 = int_to_ptr.vmem [resolvable:$false] %s1975_s17 }
 0x2f7   : > { %s1977_s27 = scalar_lea.vmem %s1976_s17, 2048  ;;  %p1978_p3 = scmp.lt.s32.totalorder %s2445_s5, %s1976_s17 }
 0x2f8   : > { %p2553_p5 = scmp.ne.s32.totalorder %s2550_s14, 0  ;;  %p1979_p8 = scmp.lt.s32.totalorder %s1977_s27, %s1971_s19 }
 0x2f9   : > { %s2552_s15 = smov %s2551_s24  ;;  %s2442_s12 = scalar_lea.hbm %s2551_s24, %s1549_s9 }
 0x2fa   : > { %p1973_p6 = pnand %p1972_p2, %p2553_p5  ;;  %p1980_p13 = por %p1979_p8, %p1978_p3 }
 0x2fc   : > { %p1974_p11 = pneg %p1973_p6 }
 0x2fe   : > { %p1981_p12 = pnand %p1980_p13, %p1974_p11 }
 0x300   : > { %1984 = shalt.err (!%p1981_p12)
}
 0x301   : > { %s1985_s18 = scalar_lea.hbm %s2442_s12, 1024  ;;  %s1989_s10 = scalar_lea.hbm %s2552_s15, 2048 }
 0x302   : > { %p1986_p7 = scmp.ne.s32.totalorder %s2442_s12, %s1985_s18  ;;  %p1990_p10 = scmp.lt.u32.totalorder %s2442_s12, %s2552_s15 }
 0x303   : > { %p1991_p0 = scmp.lt.u32.totalorder %s1989_s10, %s1985_s18  ;;  %p1993_p2 = scmp.lt.u32.totalorder %s1985_s18, %s2442_s12 }
 0x304   : > { %p1987_p4 = pnand %p1986_p7, %p2553_p5 }
 0x305   : > { %p1992_p1 = por %p1991_p0, %p1990_p10 }
 0x306   : > { %p1988_p9 = pneg %p1987_p4 }
 0x307   : > { %p1994_p6 = por %p1993_p2, %p1992_p1 }
 0x309   : > { %p1995_p11 = pnand %p1994_p6, %p1988_p9 }
 0x30b   : > { %1998 = shalt.err (!%p1995_p11)
}
 0x30c   : > { %s2100_s8 = smov 64   ;;  %s2101_s9 = smov 4  }
 0x30d   : > { %1779 = dma.vmem_to_hbm [thread:$0]  (%p2553_p5), %s2445_s5, 1024, %s2442_s12, %s1303_s21, %s2100_s8, %s2100_s8, %s2101_s9  }
 0x30e PF: > { %s2554_s13 = sld [smem:[#allocation13_spill]]  ;;  %s2555_s20 = sld [smem:[#allocation19_spill]] }
 0x30f   : > { %p1791_p3 = scmp.ge.s32.totalorder %s2089_s30, 2 }
 0x314   : > { %s1331_s24 = sand.u32 1, %s2554_s13   ;;  %p2556_p8 = scmp.ne.s32.totalorder %s2555_s20, 0 }
 0x315   : > { %s1332_s19 = scalar_lea.sflag [#allocation6], %s1331_s24 }
 0x316   : > { %p1786_p13 = pnand %p1791_p3, %p2556_p8 }
 0x318   : > { %2048 = dma.done.wait (!%p1786_p13), %s1332_s19, 1024  }
 0x319   : > { %2050 = vsyncadd (!%p1786_p13), %s1332_s19, 4294966272  ;;  %s23_s30 = sadd.s32 1, %s2089_s30   ;;  %s2557_s3 = sld [smem:[#allocation16_spill]] }
 0x31a   : > { %p20_p12 = scmp.ge.s32.totalorder %s23_s30, 6   ;;  %s2558_s11 = sld [smem:[#allocation17_spill]] }
 0x31b   : > { %s2559_s14 = sld [smem:[#allocation14_spill]]  ;;  %s2560_s12 = sld [smem:[#allocation15_spill]] }
 0x31c   : > { %s2561_s21 = smov %s2057_s22  ;;  %s2562_s22 = smov %s2061_s23 }
 0x31d   : > { %s2564_s24 = smov %s2069_s25  ;;  %s2566_s26 = smov %s2081_s28 }
 0x31e   : > { %s2567_s27 = smov %s2085_s29  ;;  %22 = sbr.rel (!%p20_p12) target bundleno = 13 (0xd), region = 153 }
 0x31f   : > { %s2563_s23 = smov %s2557_s3 }
 0x320   : > { %s2565_s25 = smov %s2558_s11 }
 0x321   : > { %s2568_s28 = smov %s2559_s14  ;;  %s2569_s29 = smov %s2560_s12 }
 0x325   :  { %1337 = vsyncpa [#allocation5], 1 }
 0x326   :  { %1339 = vsyncpa [#allocation5 + $0x1], 1 }
 0x327   :  { %1340 = vsyncpa [#allocation8], 1 }
 0x328   :  { %1341 = vsyncpa [#allocation6], 1 }
 0x329   :  { %1343 = vsyncpa [#allocation6 + $0x1], 1 }

</bundles_post_ra>
